<compile_context>
chip_gen: v6e
topology: v6e:2x2x1
jax: 0.10.0
libtpu: 0.0.40
codegen_flags: <defaults>
</compile_context>

<pallas_src>
import functools

import jax
import jax.numpy as jnp
from jax import lax
from jax.experimental import pallas as pl
from jax.experimental.pallas import tpu as pltpu

_MIB = 1024 * 1024


def _round_up(x, m):
    return ((x + m - 1) // m) * m


def _vmem_config():
    """Generation-aware (budget, vmem_limit) in bytes.

    v5e / v6e have 128 MiB physical VMEM (only the 16/32 MiB scoped default is
    small); v7x has 64 MiB per TensorCore.  Leave headroom for Mosaic internal
    scratch and the compiler's own temporaries.
    """
    try:
        cap = int(pltpu.get_tpu_info().vmem_capacity_bytes)
    except Exception:
        cap = 64 * _MIB  # conservative fallback: assume the smallest (v7x) VMEM
    limit = min(64 * _MIB, max(cap - 16 * _MIB, 16 * _MIB))
    budget = max(limit - 8 * _MIB, 8 * _MIB)  # what auto-TK plans against
    return budget, limit


def _compiler_params():
    _, limit = _vmem_config()
    return pltpu.CompilerParams(
        dimension_semantics=("arbitrary",),  # K axis is a reduction
        vmem_limit_bytes=limit,
    )


# ---------------------------------------------------------------------------
# Kernels
# ---------------------------------------------------------------------------
def _gram_kernel(f_ref, g_ref, *, inv_denom):
    """K-tiled accumulation: G += F_k @ F_k^T; scale by inv_denom on last tile."""
    k = pl.program_id(0)

    @pl.when(k == 0)
    def _():
        g_ref[...] = jnp.zeros_like(g_ref)

    f = f_ref[...]
    # Contract the last dim of both operands: F @ F^T without an explicit .T.
    g_ref[...] += lax.dot_general(
        f, f,
        dimension_numbers=(((1,), (1,)), ((), ())),
        preferred_element_type=jnp.float32,
    )

    @pl.when(k == pl.num_programs(0) - 1)
    def _():
        g_ref[...] = g_ref[...] * inv_denom


def _style_loss_kernel(f_ref, tgt_ref, loss_ref, acc_ref, *, inv_denom):
    """Accumulate the gram matrix over K tiles; epilogue computes MSE vs target."""
    k = pl.program_id(0)

    @pl.when(k == 0)
    def _():
        acc_ref[...] = jnp.zeros_like(acc_ref)

    f = f_ref[...]
    acc_ref[...] += lax.dot_general(
        f, f,
        dimension_numbers=(((1,), (1,)), ((), ())),
        preferred_element_type=jnp.float32,
    )

    # One-shot epilogue: scale, subtract target, MSE -> SMEM scalar.
    @pl.when(k == pl.num_programs(0) - 1)
    def _():
        g = acc_ref[...] * inv_denom
        diff = g - tgt_ref[...].astype(jnp.float32)
        loss_ref[0, 0] = jnp.mean(diff * diff)


# ---------------------------------------------------------------------------
# Wrapper helpers
# ---------------------------------------------------------------------------
def _prepare_features(x, tk, use_bf16, resident_bytes):
    """Reshape NCHW -> (M, K_pad) with minimal padding and pick a K tile size.

    resident_bytes = VMEM bytes held across the whole grid (accumulator/output
    double-buffers, target double-buffers, scratch).  The K tile is sized so
    two double-buffered (M, TK) feature blocks plus the residents fit the
    generation-aware VMEM budget, with at least two grid steps whenever K
    allows (so DMA of step i+1 overlaps the MXU work of step i).
    """
    a, b, c, d = x.shape
    m, k = a * b, c * d
    dtype = jnp.bfloat16 if use_bf16 else jnp.float32
    itemsize = jnp.dtype(dtype).itemsize

    k128 = _round_up(k, 128)
    budget, _ = _vmem_config()

    if tk is not None:
        # Validate / align user-supplied tile width to the (8, 128) constraint.
        tk = max(128, _round_up(int(tk), 128))
    else:
        avail = budget - resident_bytes
        if avail < 2 * m * 128 * itemsize:
            raise ValueError(
                f"StyleLoss Pallas kernel: resident (M, M) buffers for M={m} "
                f"({resident_bytes / _MIB:.1f} MiB) leave no room for K tiles "
                f"within the {budget / _MIB:.1f} MiB VMEM budget. "
                "TODO(synk): tile the (M, M) accumulator over row blocks.")
        tk_max = max(128, (avail // (2 * m * itemsize)) // 128 * 128)
        # >= 2 steps for DMA/compute overlap, ~4 when K is large enough, while
        # keeping tiles wide (>= ~512 lanes) so DMA stays near the roofline.
        nsteps = max(pl.cdiv(k128, tk_max), min(4, max(1, k128 // 512)))
        if nsteps == 1 and k128 >= 256:
            nsteps = 2
        tk = _round_up(pl.cdiv(k128, nsteps), 128)

    tk = min(tk, k128)
    nsteps = pl.cdiv(k128, tk)
    k_pad = nsteps * tk  # >= k128; waste bounded by ~nsteps*128 zero columns

    feats = x.reshape(m, k).astype(dtype)  # cast is a no-op if x is already bf16
    if k_pad != k:
        # Zero columns leave F @ F^T unchanged; pad is at most a few 128-lane
        # columns (not a full round-up-to-TK copy of F).
        feats = jnp.pad(feats, ((0, 0), (0, k_pad - k)))
    return feats, m, k_pad, tk, nsteps


# ---------------------------------------------------------------------------
# Public wrappers
# ---------------------------------------------------------------------------
def gram_matrix(x, *, tk=None, use_bf16=True):
    """Pallas gram matrix of an NCHW tensor, matching StyleLoss.gram_matrix."""
    a, b, c, d = x.shape
    inv_denom = 1.0 / float(a * b * c * d)
    m = a * b
    # Residents: double-buffered (M, M) f32 output acting as the accumulator.
    feats, m, k_pad, tk, nsteps = _prepare_features(
        x, tk, use_bf16, resident_bytes=2 * m * m * 4)

    kernel = functools.partial(_gram_kernel, inv_denom=inv_denom)
    return pl.pallas_call(
        kernel,
        out_shape=jax.ShapeDtypeStruct((m, m), jnp.float32),
        grid=(nsteps,),
        in_specs=[pl.BlockSpec((m, tk), lambda i: (0, i))],
        out_specs=pl.BlockSpec((m, m), lambda i: (0, 0)),   # resident accumulator
        compiler_params=_compiler_params(),
        cost_estimate=pl.CostEstimate(
            flops=2 * m * m * k_pad,
            bytes_accessed=feats.size * feats.dtype.itemsize + m * m * 4,
            transcendentals=0,
        ),
    )(feats)


def style_loss_forward(x, target_gram, *, tk=None, use_bf16=True):
    """Forward pass of StyleLoss: returns (input, mse(gram(input), target))."""
    a, b, c, d = x.shape
    inv_denom = 1.0 / float(a * b * c * d)
    m = a * b
    # Residents: 2x (M, M) target buffers (double-buffered by default even with
    # a constant index map) + (M, M) f32 scratch accumulator.
    feats, m, k_pad, tk, nsteps = _prepare_features(
        x, tk, use_bf16, resident_bytes=3 * m * m * 4)

    kernel = functools.partial(_style_loss_kernel, inv_denom=inv_denom)
    loss = pl.pallas_call(
        kernel,
        out_shape=jax.ShapeDtypeStruct((1, 1), jnp.float32),
        grid=(nsteps,),
        in_specs=[
            pl.BlockSpec((m, tk), lambda i: (0, i)),
            # Constant block index -> the target gram is DMA'd only once.
            pl.BlockSpec((m, m), lambda i: (0, 0)),
        ],
        out_specs=pl.BlockSpec(memory_space=pltpu.MemorySpace.SMEM),
        scratch_shapes=[pltpu.VMEM((m, m), jnp.float32)],
        compiler_params=_compiler_params(),
        cost_estimate=pl.CostEstimate(
            flops=2 * m * m * k_pad,
            bytes_accessed=feats.size * feats.dtype.itemsize + 2 * m * m * 4,
            transcendentals=0,
        ),
    )(feats, target_gram)
    # forward() returns its input unchanged; the loss is a side product.
    return x, loss[0, 0]


class StyleLoss:
    """JAX/Pallas equivalent of the PyTorch StyleLoss module."""

    def __init__(self, target_feature, *, tk=None, use_bf16=True):
        self._tk = tk
        self._use_bf16 = use_bf16
        self.target = gram_matrix(target_feature, tk=tk, use_bf16=use_bf16)
        self.loss = None

    def __call__(self, x):
        out, self.loss = style_loss_forward(
            x, self.target, tk=self._tk, use_bf16=self._use_bf16)
        return out


# ---------------------------------------------------------------------------
# Reference (pure JAX) for a quick sanity check
# ---------------------------------------------------------------------------
def _gram_ref(x, use_bf16):
    a, b, c, d = x.shape
    f = x.reshape(a * b, c * d)
    f = f.astype(jnp.bfloat16 if use_bf16 else jnp.float32)
    g = jnp.dot(f, f.T, preferred_element_type=jnp.float32)
    return g / (a * b * c * d)


def _loss_ref(x, target, use_bf16):
    g = _gram_ref(x, use_bf16)
    return jnp.mean((g - target) ** 2)


if __name__ == "__main__":
    key = jax.random.PRNGKey(0)
    k1, k2 = jax.random.split(key)

    # Small NCHW shapes consistent with a VGG feature map: M=8, K=256.
    target_feature = jax.random.normal(k1, (2, 4, 16, 16), dtype=jnp.float32)
    x = jax.random.normal(k2, (2, 4, 16, 16), dtype=jnp.float32)

    # Default (bf16-streamed) path; tk=128 forces two K steps so the tiled
    # accumulation + epilogue path is exercised.
    module = StyleLoss(target_feature, tk=128)
    out = module(x)
    jax.block_until_ready((out, module.loss, module.target))

    # Auto-TK bf16 path (>= 2 steps for this shape) and explicit f32 path.
    g_auto = gram_matrix(x)
    g_f32 = gram_matrix(x, use_bf16=False)
    jax.block_until_ready((g_auto, g_f32))

    # f32 module for exact parity with the PyTorch reference semantics.
    module_f32 = StyleLoss(target_feature, use_bf16=False)
    out_f32 = module_f32(x)
    jax.block_until_ready((out_f32, module_f32.loss))

    # References.
    ref_tgt_bf16 = _gram_ref(target_feature, use_bf16=True)
    ref_g_bf16 = _gram_ref(x, use_bf16=True)
    ref_loss_bf16 = jnp.mean((ref_g_bf16 - ref_tgt_bf16) ** 2)
    ref_tgt_f32 = _gram_ref(target_feature, use_bf16=False)
    ref_g_f32 = _gram_ref(x, use_bf16=False)
    ref_loss_f32 = _loss_ref(x, ref_tgt_f32, use_bf16=False)

    # bf16-streamed path vs a reference using the same bf16 feature cast.
    assert jnp.allclose(module.target, ref_tgt_bf16, atol=1e-5, rtol=1e-4)
    assert jnp.allclose(g_auto, ref_g_bf16, atol=1e-5, rtol=1e-4)
    assert jnp.allclose(module.loss, ref_loss_bf16, atol=1e-6, rtol=1e-4)
    # f32 path vs pure f32 reference (PyTorch-equivalent semantics).
    assert jnp.allclose(g_f32, ref_g_f32, atol=1e-5, rtol=1e-4)
    assert jnp.allclose(module_f32.target, ref_tgt_f32, atol=1e-5, rtol=1e-4)
    assert jnp.allclose(module_f32.loss, ref_loss_f32, atol=1e-6, rtol=1e-4)
    # forward() returns its input unchanged.
    assert jnp.array_equal(out, x)
    assert jnp.array_equal(out_f32, x)

    print("KERNEL_OK")
</pallas_src>

<mosaic_0001>
module attributes {stable_mosaic.version = 11 : i64} {
  func.func @_gram_kernel(%arg0: i32, %arg1: memref<8x128xbf16, #tpu.memory_space<vmem>>, %arg2: memref<8x8xf32, #tpu.memory_space<vmem>>) attributes {dimension_semantics = [#tpu.dimension_semantics<arbitrary>], iteration_bounds = array<i64: 2>, scalar_prefetch = 0 : i64, scratch_operands = 0 : i64, tpu.core_type = #tpu.core_type<tc>, window_params = [{transform_indices = @transform_0, window_bounds = array<i64: 8, 128>}, {pipeline_mode = #tpu.pipeline_mode<synchronous>, transform_indices = @transform_1, window_bounds = array<i64: 8, 8>}]} {
    %c0_i32 = arith.constant 0 : i32
    %0 = arith.cmpi eq, %arg0, %c0_i32 : i32
    %1 = arith.extui %0 : i1 to i32
    %c0_i32_0 = arith.constant 0 : i32
    %2 = arith.cmpi ne, %1, %c0_i32_0 : i32
    scf.if %2 {
      %cst_7 = arith.constant 0.000000e+00 : f32
      %11 = vector.broadcast %cst_7 : f32 to vector<8x8xf32>
      %c0_8 = arith.constant 0 : index
      %c0_9 = arith.constant 0 : index
      %12 = vector.load %arg2[%c0_8, %c0_9] : memref<8x8xf32, #tpu.memory_space<vmem>>, vector<8x8xf32>
      tpu.vector_store %arg2[%c0_8, %c0_9], %11 {strides = array<i32>} : memref<8x8xf32, #tpu.memory_space<vmem>>, vector<8x8xf32>,
    } else {
    }
    %c0 = arith.constant 0 : index
    %c0_1 = arith.constant 0 : index
    %3 = vector.load %arg1[%c0, %c0_1] : memref<8x128xbf16, #tpu.memory_space<vmem>>, vector<8x128xbf16>
    %c0_2 = arith.constant 0 : index
    %c0_3 = arith.constant 0 : index
    %4 = vector.load %arg2[%c0_2, %c0_3] : memref<8x8xf32, #tpu.memory_space<vmem>>, vector<8x8xf32>
    %cst = arith.constant dense<0.000000e+00> : vector<8x8xf32>
    %5 = tpu.matmul %3, %3, %cst {dimension_numbers = #tpu.dot_dimension_numbers<[1], [1], [0], [0], [0, 0, 1, 0], [], []>} : vector<8x128xbf16>, vector<8x128xbf16>, vector<8x8xf32> -> vector<8x8xf32>
    %6 = arith.addf %4, %5 : vector<8x8xf32>
    %c0_4 = arith.constant 0 : index
    %c0_5 = arith.constant 0 : index
    %7 = vector.load %arg2[%c0_4, %c0_5] : memref<8x8xf32, #tpu.memory_space<vmem>>, vector<8x8xf32>
    tpu.vector_store %arg2[%c0_4, %c0_5], %6 {strides = array<i32>} : memref<8x8xf32, #tpu.memory_space<vmem>>, vector<8x8xf32>,
    %c1_i32 = arith.constant 1 : i32
    %8 = arith.cmpi eq, %arg0, %c1_i32 : i32
    %9 = arith.extui %8 : i1 to i32
    %c0_i32_6 = arith.constant 0 : i32
    %10 = arith.cmpi ne, %9, %c0_i32_6 : i32
    scf.if %10 {
      %c0_7 = arith.constant 0 : index
      %c0_8 = arith.constant 0 : index
      %11 = vector.load %arg2[%c0_7, %c0_8] : memref<8x8xf32, #tpu.memory_space<vmem>>, vector<8x8xf32>
      %cst_9 = arith.constant 4.8828125E-4 : f32
      %12 = vector.broadcast %cst_9 : f32 to vector<8x8xf32>
      %13 = arith.mulf %11, %12 : vector<8x8xf32>
      %c0_10 = arith.constant 0 : index
      %c0_11 = arith.constant 0 : index
      %14 = vector.load %arg2[%c0_10, %c0_11] : memref<8x8xf32, #tpu.memory_space<vmem>>, vector<8x8xf32>
      tpu.vector_store %arg2[%c0_10, %c0_11], %13 {strides = array<i32>} : memref<8x8xf32, #tpu.memory_space<vmem>>, vector<8x8xf32>,
    } else {
    }
    return
  }
  func.func @transform_0(%arg0: i32) -> (i32, i32) {
    %c0_i32 = arith.constant 0 : i32
    %c0_i32_0 = arith.constant 0 : i32
    return %c0_i32, %arg0 : i32, i32
  }
  func.func @transform_1(%arg0: i32) -> (i32, i32) {
    %c0_i32 = arith.constant 0 : i32
    %c0_i32_0 = arith.constant 0 : i32
    %c0_i32_1 = arith.constant 0 : i32
    return %c0_i32, %c0_i32_0 : i32, i32
  }
}

</mosaic_0001>

<bundles_post_ra>
// kernel: tpu_custom_call.1
= control target key start
LH: loop header
LB: loop body
LE: loop exit
PB: predicated region body
PF: predicated region fallthrough
CT: control target
= control target key end

     0   :  { %6 = vsyncpa [#allocation3], 0  ;;  %s522_s0 = inlined_call_operand.hbm [shape: bf16[8,256], index: 0, kind: input, shape index: {}]   ;;  %s523_s1 = inlined_call_operand.hbm [shape: f32[8,8], index: 1, kind: output, shape index: {}]  }
   0x1   :  { %8 = vsyncpa [#allocation3 + $0x1], 0 }
   0x2   :  { %9 = vsyncpa [#allocation4], 0  ;;  %s413_s6 = smov 0   ;;  %s415_s7 = smov 0  }
   0x3   :  { %s417_s8 = smov 0   ;;  %s419_s9 = smov 0  }
   0x4 LB: > { %s432_s10 = sadd.s32 4294967295, %s396_s9   ;;  %s435_s11 = sadd.s32 1, %s396_s9   ;;  %s396_s9 = sphi %s419_s9, %s533_s9   ;;  %s392_s8 = sphi %s417_s8, %s532_s8   ;;  %s388_s7 = sphi %s415_s7, %s531_s7   ;;  %s384_s6 = sphi %s413_s6, %s530_s6  }
   0x5   : > { %s19_s12 = ssub.s32 %s396_s9, %s435_s11  ;;  %s22_s13 = sadd.s32 1, %s392_s8 }
   0x6   : > { %p20_p0 = scmp.eq.s32.totalorder %s19_s12, 0  ;;  %p29_p1 = scmp.ne.s32.totalorder %s392_s8, %s388_s7 }
   0x7   : > { %p30_p2 = scmp.eq.s32.totalorder %s396_s9, 0  ;;  %p35_p3 = scmp.ne.s32.totalorder %s388_s7, %s384_s6 }
   0x8   : > { %s445_s14 = scalar_select %p20_p0, %s392_s8, %s22_s13  }
   0x9   : > { %p31_p4 = por %p30_p2, %p29_p1  ;;  %p36_p5 = scmp.eq.s32.totalorder %s432_s10, 0 }
   0xa   : > { %p267_p6 = scmp.lt.s32.totalorder %s396_s9, 2  ;;  %s80_s16 = sand.u32 1, %s392_s8  }
   0xb   : > { %p449_p7 = por %p36_p5, %p35_p3  ;;  %s239_s17 = sshll.u32 %s80_s16, 2 }
   0xc   : > { %s240_s18 = sshll.u32 %s396_s9, 6  ;;  %s84_s22 = scalar_lea.vmem [#allocation2], %s239_s17 }
   0xd   : > { %s525_s15 = scalar_select %p449_p7, 1, 0 }
   0xe   : > { %s458_s21 = scalar_lea.hbm %s522_s0, %s240_s18  ;;  %s91_s23 = sshll.u32 %s84_s22, 4  ;;  %s460_s23 = int_to_ptr.vmem [resolvable:$true] %s91_s23 }
   0xf   : > { %p462_p8 = pnand %p267_p6, %p31_p4  ;;  %s81_s25 = scalar_lea.sflag [#allocation3], %s80_s16 }
  0x10   : > { %s306_s26 = scalar_lea.hbm %s458_s21, 64  ;;  %s311_s29 = scalar_lea.hbm %s522_s0, 128 }
  0x11   : > { %p307_p11 = scmp.ne.s32.totalorder %s458_s21, %s306_s26  ;;  %p308_p12 = pneg %p462_p8 }
  0x12   : > { %p312_p1 = scmp.lt.s32.totalorder %s458_s21, %s522_s0  ;;  %p313_p2 = scmp.lt.s32.totalorder %s311_s29, %s306_s26 }
  0x13   : > { %p309_p13 = pnand %p308_p12, %p307_p11 }
  0x14   : > { %p314_p3 = por %p313_p2, %p312_p1 }
  0x15   : > { %p310_p0 = pneg %p309_p13 }
  0x17   : > { %p315_p4 = pnand %p314_p3, %p310_p0 }
  0x19   : > { %318 = shalt.err (!%p315_p4)
}
  0x1a   : > { %s319_s3 = scalar_lea.vmem %s460_s23, 64  ;;  %s398_s4 = smov [#allocation2]  }
  0x1b   : > { %p320_p5 = scmp.ne.s32.totalorder %s460_s23, %s319_s3  ;;  %s324_s5 = sshll.u32 %s398_s4, 4  ;;  %s325_s5 = int_to_ptr.vmem [resolvable:$false] %s324_s5 }
  0x1c   : > { %s326_s6 = scalar_lea.vmem %s325_s5, 128  ;;  %p327_p13 = scmp.lt.s32.totalorder %s460_s23, %s325_s5 }
  0x1d   : > { %p322_p6 = pnand %p320_p5, %p308_p12  ;;  %p328_p9 = scmp.lt.s32.totalorder %s326_s6, %s319_s3 }
  0x1f   : > { %p323_p11 = pneg %p322_p6  ;;  %p329_p10 = por %p328_p9, %p327_p13 }
  0x21   : > { %p330_p7 = pnand %p329_p10, %p323_p11 }
  0x23   : > { %333 = shalt.err (!%p330_p7)
}
  0x24   : > { %266 = dma.hbm_to_vmem [thread:$0]  (!%p462_p8), %s458_s21, 64, %s460_s23, %s81_s25  }
  0x25   : > { %p527_p0 = scmp.lt.s32.totalorder %s396_s9, 3  ;;  %p528_p1 = scmp.ge.s32.totalorder %s396_s9, 1 }
  0x27   : > { %p97_p12 = pnand %p528_p1, %p527_p0 }
  0x28   : > { %s102_s12 = sand.u32 (!%p97_p12), 1, %s388_s7   ;;  %p529_p9 = scmp.ne.s32.totalorder (!%p97_p12), %s525_s15, 0 }
  0x29   : > { %100 = sbr.rel (%p97_p12) target bundleno = 286 (0x11e), region = 24  ;;  %s242_s13 = sshll.u32 (!%p97_p12), %s102_s12, 2 }
  0x2a   : > { %s103_s16 = scalar_lea.sflag (!%p97_p12), [#allocation3], %s102_s12  ;;  %s106_s17 = scalar_lea.vmem (!%p97_p12), [#allocation2], %s242_s13 }
  0x2e   : > { %375 = dma.done.wait (%p529_p9), %s103_s16, 64  }
  0x2f   : > { %377 = vsyncadd (%p529_p9), %s103_s16, 4294967232  ;;  %p243_p7 = scmp.ne.s32.totalorder %s432_s10, 0 }
  0x31   : > { %124 = sbr.rel (%p243_p7) target bundleno = 56 (0x38), region = 32 }
  0x36   : > { %vm125_vm0 = vcmask 64512   ;;  %v399_v0 = vmov 0.0  }
  0x37   : > { %126 = vst.msk [vmem:[#allocation5] sm:$0xff] %vm125_vm0, %v399_v0 }
  0x38 PF: > { %v127_v1 = vld [vmem:[%s106_s17] sm:$0xf]  ;;  %v400_v2 = vmov 0.0   ;;  %vm401_vm1 = vmmov 0   ;;  %vm170_vm2 = vcmask 64512   ;;  %p244_p8 = scmp.ne.s32.totalorder %s432_s10, 1 }
  0x39   : > { %251 = vmatprep.subr.bf16.mxu0 %v400_v2  ;;  %253 = vmatprep.mubr.msk.bf16.mxu0 %vm401_vm1, %v400_v2 }
  0x3a   : > { %252 = vmatpush3.bf16.xpose.msra.mxu0 %v127_v1 }
  0x3e   : > { %v128_v3 = vld [vmem:[#allocation5] sm:$0xff] }
  0x41   : > { %254 = vmatmul.mubr.bf16.vlgmr.msra.gmra.mxu0 %v127_v1 }
 0x101   : > { %v163_v4 = vpop.f32.mrf.mxu0 }
 0x102   : > { %v169_v5 = vadd.f32 %v163_v4, %v128_v3 }
 0x103   : > { %v255_v6 = vpop.f32.mrf.mxu0  ;;  %175 = sbr.rel (%p244_p8) target bundleno = 271 (0x10f), region = 36 }
 0x104   : > { %171 = vst.msk [vmem:[#allocation5] sm:$0xff] %vm170_vm2, %v169_v5 }
 0x105   : > { %v166_v7 = vpop.f32.mrf.mxu0 }
 0x107   : > { %v256_v8 = vpop.f32.mrf.mxu0 }
 0x10b   : > { %v176_v9 = vld [vmem:[#allocation5] sm:$0xff] }
 0x10c   : > { %v177_v10 = vmul.f32 0.00048828125, %v176_v9 }
 0x10e   : > { %178 = vst.msk [vmem:[#allocation5] sm:$0xff] %vm170_vm2, %v177_v10 }
 0x10f PF: > { %p268_p10 = scmp.eq.s32.totalorder %s432_s10, 1  ;;  %s402_s9 = smov [#allocation5]  }
 0x110   : > { %s186_s15 = sshll.u32 %s402_s9, 4  ;;  %s187_s15 = int_to_ptr.vmem [resolvable:$true] %s186_s15 }
 0x111   : > { %s334_s18 = scalar_lea.vmem %s187_s15, 128  ;;  %p341_p5 = scmp.lt.s32.totalorder %s187_s15, %s187_s15 }
 0x112   : > { %p335_p2 = scmp.ne.s32.totalorder %s187_s15, %s334_s18  ;;  %p342_p6 = scmp.lt.s32.totalorder %s334_s18, %s334_s18 }
 0x114   : > { %p336_p3 = pnand %p335_p2, %p268_p10  ;;  %p343_p11 = por %p342_p6, %p341_p5 }
 0x116   : > { %p337_p4 = pneg %p336_p3 }
 0x118   : > { %p344_p13 = pnand %p343_p11, %p337_p4 }
 0x11a   : > { %347 = shalt.err (!%p344_p13)
}
 0x11b   : > { %260 = dma.vmem_to_hbm [thread:$0]  (%p268_p10), %s187_s15, 128, %s523_s1, [#allocation4]  }
 0x11c   : > { %379 = dma.done.wait (%p268_p10), [#allocation4], 128  }
 0x11d   : > { %381 = vsyncadd (%p268_p10), [#allocation4], 4294967168 }
 0x11e PF: > { %p12_p0 = scmp.ge.s32.totalorder %s435_s11, 4   ;;  %s530_s6 = smov %s388_s7 }
 0x11f   : > { %s531_s7 = smov %s392_s8  ;;  %s532_s8 = smov %s445_s14 }
 0x120   : > { %s533_s9 = smov %s435_s11  ;;  %14 = sbr.rel (!%p12_p0) target bundleno = 4 (0x4), region = 69 }
 0x125   :  { %199 = vsyncpa [#allocation3], 1 }
 0x126   :  { %201 = vsyncpa [#allocation3 + $0x1], 1 }
 0x127   :  { %202 = vsyncpa [#allocation4], 1 }
 0x128   :  { %204 = vsyncpa [#allocation4 + $0x1], 1 }

</bundles_post_ra>
